<compile_context>
chip_gen: v5e
topology: v5e:2x2
jax: 0.10.0
libtpu: 0.0.40
codegen_flags: <defaults>
</compile_context>

<pallas_src>
import math
import jax
import jax.numpy as jnp
from jax.experimental import pallas as pl
from jax.experimental.pallas import tpu as pltpu

H_NEURONS = 64
H_NEURONS2 = 16


def _round_up(n, m):
    return ((n + m - 1) // m) * m


def critic_kernel(x_ref, w1_ref, b1_ref, w2_ref, b2_ref, w3_ref, b3_ref, out_ref):
    # fc1 + ReLU (MXU, f32 accumulation)
    h1 = jnp.dot(x_ref[...], w1_ref[...], preferred_element_type=jnp.float32)
    h1 = jnp.maximum(h1 + b1_ref[...], 0.0)
    # fc2 + ReLU (MXU, f32 accumulation)
    h2 = jnp.dot(h1, w2_ref[...], preferred_element_type=jnp.float32)
    h2 = jnp.maximum(h2 + b2_ref[...], 0.0)
    # state_value head: N=1 "matmul" done as per-lane multiply + 16-wide cross-lane
    # reduce (VPU + XLU) instead of an MXU matmul; b3 is an SMEM scalar.
    v = jnp.sum(h2 * w3_ref[...], axis=-1, keepdims=True) + b3_ref[0]
    out_ref[...] = v.astype(out_ref.dtype)


def critic_forward(x, params, *, tm=1024):
    """x: [B, state_size] float32 -> value: [B, 1] float32."""
    w1, b1, w2, b2, w3, b3 = params
    B, S = x.shape

    # Batch tile: as large as reasonable (x buffering is tiny: TM*S*4B*2 buffers),
    # multiple of 8 (sublane); pad B up to a whole number of tiles.
    tile = min(tm, _round_up(B, 8))
    Bp = _round_up(B, tile)
    if Bp != B:
        x = jnp.pad(x, ((0, Bp - B), (0, 0)))
    grid = (Bp // tile,)

    w3_row = jnp.reshape(w3, (1, H_NEURONS2))          # (16, 1) -> (1, 16)
    b3_s = jnp.reshape(b3, (1,)).astype(jnp.float32)   # scalar for SMEM

    # Weights/biases: whole array, constant index map -> resident across grid steps.
    resident = lambda a: pl.BlockSpec(a.shape, lambda i: (0, 0))

    out = pl.pallas_call(
        critic_kernel,
        out_shape=jax.ShapeDtypeStruct((Bp, 1), jnp.float32),
        grid=grid,
        in_specs=[
            pl.BlockSpec((tile, S), lambda i: (i, 0)),          # x: streamed per batch tile
            resident(w1), resident(b1),
            resident(w2), resident(b2),
            resident(w3_row),
            pl.BlockSpec(memory_space=pltpu.MemorySpace.SMEM),  # b3 scalar in SMEM
        ],
        out_specs=pl.BlockSpec((tile, 1), lambda i: (i, 0)),
        compiler_params=pltpu.CompilerParams(
            dimension_semantics=("parallel",),
        ),
    )(x, w1, b1, w2, b2, w3_row, b3_s)
    return out[:B]


def init_critic_params(key, state_size):
    """Deterministic init mimicking PyTorch nn.Linear default (uniform +/- 1/sqrt(fan_in)).
    Weights stored as [in, out]; biases as [1, out]."""
    ks = jax.random.split(key, 6)

    def linear(kw, kb, fan_in, fan_out):
        bound = 1.0 / math.sqrt(fan_in)
        w = jax.random.uniform(kw, (fan_in, fan_out), jnp.float32, -bound, bound)
        b = jax.random.uniform(kb, (1, fan_out), jnp.float32, -bound, bound)
        return w, b

    w1, b1 = linear(ks[0], ks[1], state_size, H_NEURONS)
    w2, b2 = linear(ks[2], ks[3], H_NEURONS, H_NEURONS2)
    w3, b3 = linear(ks[4], ks[5], H_NEURONS2, 1)
    return (w1, b1, w2, b2, w3, b3)


def critic_ref(x, params):
    """Pure-JAX reference for validation."""
    w1, b1, w2, b2, w3, b3 = params
    h1 = jnp.maximum(x @ w1 + b1, 0.0)
    h2 = jnp.maximum(h1 @ w2 + b2, 0.0)
    return h2 @ w3 + b3


if __name__ == "__main__":
    key = jax.random.PRNGKey(0)
    k_param, k_x, k_x2 = jax.random.split(key, 3)

    batch = 2
    state_size = 8

    params = init_critic_params(k_param, state_size)

    # Small-shape check (batch not a multiple of the sublane width -> padded path).
    x = jax.random.normal(k_x, (batch, state_size), dtype=jnp.float32)
    value = jax.block_until_ready(critic_forward(x, params))
    ref = critic_ref(x, params)
    assert value.shape == (batch, 1), value.shape
    assert jnp.allclose(value, ref, atol=1e-5, rtol=1e-5), (value, ref)

    # Multi-tile grid check (exercises batch grid + padding + resident weights).
    batch2 = 300
    x2 = jax.random.normal(k_x2, (batch2, state_size), dtype=jnp.float32)
    value2 = jax.block_until_ready(critic_forward(x2, params, tm=128))
    ref2 = critic_ref(x2, params)
    assert value2.shape == (batch2, 1), value2.shape
    assert jnp.allclose(value2, ref2, atol=1e-5, rtol=1e-5)

    print("KERNEL_OK")
</pallas_src>

<mosaic_0001>
module attributes {stable_mosaic.version = 11 : i64} {
  func.func @critic_kernel(%arg0: i32, %arg1: memref<8x8xf32, #tpu.memory_space<vmem>>, %arg2: memref<8x64xf32, #tpu.memory_space<vmem>>, %arg3: memref<1x64xf32, #tpu.memory_space<vmem>>, %arg4: memref<64x16xf32, #tpu.memory_space<vmem>>, %arg5: memref<1x16xf32, #tpu.memory_space<vmem>>, %arg6: memref<1x16xf32, #tpu.memory_space<vmem>>, %arg7: memref<1xf32, #tpu.memory_space<smem>>, %arg8: memref<8x1xf32, #tpu.memory_space<vmem>>) attributes {dimension_semantics = [#tpu.dimension_semantics<parallel>], iteration_bounds = array<i64: 1>, scalar_prefetch = 0 : i64, scratch_operands = 0 : i64, tpu.core_type = #tpu.core_type<tc>, window_params = [{transform_indices = @transform_0, window_bounds = array<i64: 8, 8>}, {pipeline_mode = #tpu.pipeline_mode<synchronous>, transform_indices = @transform_1, window_bounds = array<i64: 8, 64>}, {pipeline_mode = #tpu.pipeline_mode<synchronous>, transform_indices = @transform_2, window_bounds = array<i64: 1, 64>}, {pipeline_mode = #tpu.pipeline_mode<synchronous>, transform_indices = @transform_3, window_bounds = array<i64: 64, 16>}, {pipeline_mode = #tpu.pipeline_mode<synchronous>, transform_indices = @transform_4, window_bounds = array<i64: 1, 16>}, {pipeline_mode = #tpu.pipeline_mode<synchronous>, transform_indices = @transform_5, window_bounds = array<i64: 1, 16>}, {transform_indices = @transform_6, window_bounds = array<i64: 1>}, {transform_indices = @transform_7, window_bounds = array<i64: 8, 1>}]} {
    %c0 = arith.constant 0 : index
    %c0_0 = arith.constant 0 : index
    %0 = vector.load %arg1[%c0, %c0_0] : memref<8x8xf32, #tpu.memory_space<vmem>>, vector<8x8xf32>
    %c0_1 = arith.constant 0 : index
    %c0_2 = arith.constant 0 : index
    %1 = vector.load %arg2[%c0_1, %c0_2] : memref<8x64xf32, #tpu.memory_space<vmem>>, vector<8x64xf32>
    %cst = arith.constant dense<0.000000e+00> : vector<8x64xf32>
    %2 = tpu.matmul %0, %1, %cst {dimension_numbers = #tpu.dot_dimension_numbers<[1], [0], [0], [1], [0, 0, 1, 1], [], []>} : vector<8x8xf32>, vector<8x64xf32>, vector<8x64xf32> -> vector<8x64xf32>
    %c0_3 = arith.constant 0 : index
    %c0_4 = arith.constant 0 : index
    %3 = vector.load %arg3[%c0_3, %c0_4] : memref<1x64xf32, #tpu.memory_space<vmem>>, vector<1x64xf32>
    %4 = vector.broadcast %3 : vector<1x64xf32> to vector<8x64xf32>
    %5 = arith.addf %2, %4 : vector<8x64xf32>
    %cst_5 = arith.constant 0.000000e+00 : f32
    %6 = vector.broadcast %cst_5 : f32 to vector<8x64xf32>
    %7 = arith.maximumf %5, %6 : vector<8x64xf32>
    %c0_6 = arith.constant 0 : index
    %c0_7 = arith.constant 0 : index
    %8 = vector.load %arg4[%c0_6, %c0_7] : memref<64x16xf32, #tpu.memory_space<vmem>>, vector<64x16xf32>
    %cst_8 = arith.constant dense<0.000000e+00> : vector<8x16xf32>
    %9 = tpu.matmul %7, %8, %cst_8 {dimension_numbers = #tpu.dot_dimension_numbers<[1], [0], [0], [1], [0, 0, 1, 1], [], []>} : vector<8x64xf32>, vector<64x16xf32>, vector<8x16xf32> -> vector<8x16xf32>
    %c0_9 = arith.constant 0 : index
    %c0_10 = arith.constant 0 : index
    %10 = vector.load %arg5[%c0_9, %c0_10] : memref<1x16xf32, #tpu.memory_space<vmem>>, vector<1x16xf32>
    %11 = vector.broadcast %10 : vector<1x16xf32> to vector<8x16xf32>
    %12 = arith.addf %9, %11 : vector<8x16xf32>
    %cst_11 = arith.constant 0.000000e+00 : f32
    %13 = vector.broadcast %cst_11 : f32 to vector<8x16xf32>
    %14 = arith.maximumf %12, %13 : vector<8x16xf32>
    %c0_12 = arith.constant 0 : index
    %c0_13 = arith.constant 0 : index
    %15 = vector.load %arg6[%c0_12, %c0_13] : memref<1x16xf32, #tpu.memory_space<vmem>>, vector<1x16xf32>
    %16 = vector.broadcast %15 : vector<1x16xf32> to vector<8x16xf32>
    %17 = arith.mulf %14, %16 : vector<8x16xf32>
    %cst_14 = arith.constant dense<0.000000e+00> : vector<8xf32>
    %18 = vector.multi_reduction <add>, %17, %cst_14 [1] : vector<8x16xf32> to vector<8xf32>
    %19 = vector.shape_cast %18 : vector<8xf32> to vector<8x1xf32>
    %c0_15 = arith.constant 0 : index
    %20 = memref.load %arg7[%c0_15] : memref<1xf32, #tpu.memory_space<smem>>
    %21 = vector.broadcast %20 : f32 to vector<8x1xf32>
    %22 = arith.addf %19, %21 : vector<8x1xf32>
    %c0_16 = arith.constant 0 : index
    %c0_17 = arith.constant 0 : index
    %23 = vector.load %arg8[%c0_16, %c0_17] : memref<8x1xf32, #tpu.memory_space<vmem>>, vector<8x1xf32>
    tpu.vector_store %arg8[%c0_16, %c0_17], %22 {strides = array<i32>} : memref<8x1xf32, #tpu.memory_space<vmem>>, vector<8x1xf32>,
    return
  }
  func.func @transform_0(%arg0: i32) -> (i32, i32) {
    %c0_i32 = arith.constant 0 : i32
    %c0_i32_0 = arith.constant 0 : i32
    return %arg0, %c0_i32 : i32, i32
  }
  func.func @transform_1(%arg0: i32) -> (i32, i32) {
    %c0_i32 = arith.constant 0 : i32
    %c0_i32_0 = arith.constant 0 : i32
    %c0_i32_1 = arith.constant 0 : i32
    return %c0_i32, %c0_i32_0 : i32, i32
  }
  func.func @transform_2(%arg0: i32) -> (i32, i32) {
    %c0_i32 = arith.constant 0 : i32
    %c0_i32_0 = arith.constant 0 : i32
    %c0_i32_1 = arith.constant 0 : i32
    return %c0_i32, %c0_i32_0 : i32, i32
  }
  func.func @transform_3(%arg0: i32) -> (i32, i32) {
    %c0_i32 = arith.constant 0 : i32
    %c0_i32_0 = arith.constant 0 : i32
    %c0_i32_1 = arith.constant 0 : i32
    return %c0_i32, %c0_i32_0 : i32, i32
  }
  func.func @transform_4(%arg0: i32) -> (i32, i32) {
    %c0_i32 = arith.constant 0 : i32
    %c0_i32_0 = arith.constant 0 : i32
    %c0_i32_1 = arith.constant 0 : i32
    return %c0_i32, %c0_i32_0 : i32, i32
  }
  func.func @transform_5(%arg0: i32) -> (i32, i32) {
    %c0_i32 = arith.constant 0 : i32
    %c0_i32_0 = arith.constant 0 : i32
    %c0_i32_1 = arith.constant 0 : i32
    return %c0_i32, %c0_i32_0 : i32, i32
  }
  func.func @transform_6(%arg0: i32) -> i32 {
    %c0_i32 = arith.constant 0 : i32
    %c0_i32_0 = arith.constant 0 : i32
    return %c0_i32 : i32
  }
  func.func @transform_7(%arg0: i32) -> (i32, i32) {
    %c0_i32 = arith.constant 0 : i32
    %c0_i32_0 = arith.constant 0 : i32
    return %arg0, %c0_i32 : i32, i32
  }
}

</mosaic_0001>

<bundles_post_ra>
// kernel: tpu_custom_call.1
= control target key start
LH: loop header
LB: loop body
LE: loop exit
PB: predicated region body
PF: predicated region fallthrough
CT: control target
= control target key end

     0   :  { %vm33_vm0 = vcmask 64512   ;;  %vm70_vm1 = vcmask 523264   ;;  %vm100_vm2 = vcmask 130048   ;;  %vm107_vm3 = vcmask 7168   ;;  %s203_s1 = inlined_call_operand.vmem [shape: f32[8,64], index: 1, kind: input, shape index: {}]   ;;  %s204_s0 = inlined_call_operand.vmem [shape: f32[8,8], index: 0, kind: input, shape index: {}]   ;;  %s205_s3 = inlined_call_operand.vmem [shape: f32[64,16], index: 3, kind: input, shape index: {}]   ;;  %s206_s2 = inlined_call_operand.vmem [shape: f32[1,64], index: 2, kind: input, shape index: {}]   ;;  %s207_s4 = inlined_call_operand.vmem [shape: f32[1,16], index: 4, kind: input, shape index: {}]   ;;  %s208_s5 = inlined_call_operand.vmem [shape: f32[1,16], index: 5, kind: input, shape index: {}]   ;;  %s209_s6 = inlined_call_operand.<no memory space> [shape: f32[1], index: 6, kind: input, shape index: {}]   ;;  %s210_s7 = inlined_call_operand.vmem [shape: f32[8,1], index: 7, kind: output, shape index: {}]  }
   0x1   :  { %v28_v0 = vld [vmem:[%s203_s1] sm:$0xff]  ;;  %v65_v2 = vld [vmem:[%s205_s3 + $0x38] sm:$0xff]  ;;  %v64_v3 = vld [vmem:[%s205_s3 + $0x30] sm:$0xff]  ;;  %v105_v21 = vstv %s209_s6 }
   0x2   :  { %v27_v1 = vld [vmem:[%s204_s0] sm:$0xff]  ;;  %52 = vmatpush.msra.mxu0 %v28_v0  ;;  %82 = vmatpush.msra.mxu1 %v65_v2  ;;  %v63_v4 = vld [vmem:[%s205_s3 + $0x28] sm:$0xff]  ;;  %v61_v6 = vld [vmem:[%s205_s3 + $0x18] sm:$0xff] }
   0x3   :  { %113 = vmatmul.msk.f32.vlgmr.msra.gmra.mxu0 %vm33_vm0, %v27_v1  ;;  %v62_v5 = vld [vmem:[%s205_s3 + $0x20] sm:$0xff]  ;;  %v60_v7 = vld [vmem:[%s205_s3 + $0x10] sm:$0xff]  ;;  %v59_v8 = vld [vmem:[%s205_s3 + $0x8] sm:$0xff] }
   0x4   :  { %83 = vmatpush.msra.mxu1 %v64_v3  ;;  %v58_v9 = vld [vmem:[%s205_s3] sm:$0xff] }
   0x5   :  { %v115_v10 = vld [vmem:[%s206_s2] ss:$0 sm:$0xff] }
   0x6   :  { %84 = vmatpush.msra.mxu1 %v63_v4  ;;  %v116_v14 = vld [vmem:[%s207_s4] ss:$0 sm:$0xff] }
   0x7   :  { %v117_v17 = vld [vmem:[%s208_s5] ss:$0 sm:$0xff] }
   0x8   :  { %85 = vmatpush.msra.mxu1 %v62_v5 }
   0xa   :  { %86 = vmatpush.msra.mxu1 %v61_v6 }
   0xc   :  { %87 = vmatpush.msra.mxu1 %v60_v7 }
   0xe   :  { %88 = vmatpush.msra.mxu1 %v59_v8 }
  0x10   :  { %89 = vmatpush.msra.mxu1 %v58_v9 }
  0x80   :  { %v54_v11 = vpop.f32.mrf.mxu0 }
  0x81   :  { %v55_v12 = vadd.f32 %v115_v10, %v54_v11 }
  0x83   :  { %v57_v13 = vmax.f32 %v55_v12, 0.0 }
  0x85   :  { %114 = vmatmul.msk.f32.vlgmr.msra.gmra.mxu1 %vm70_vm1, %v57_v13 }
 0x102   :  { %v91_v15 = vpop.f32.mrf.mxu1 }
 0x103   :  { %v92_v16 = vadd.f32 %v116_v14, %v91_v15 }
 0x105   :  { %v94_v18 = vmax.f32 %v92_v16, 0.0 }
 0x107   :  { %v99_v19 = vmul.f32 %v117_v17, %v94_v18 }
 0x109   :  { %v101_v20 = vsel %vm100_vm2, %v99_v19, 0.0 }
 0x10a   :  { %102 = vadd.xlane.f32.xlu0 %v101_v20 }
 0x17d   :  { %v103_v22 = vpop.xlane.xlu0 %102 }
 0x17e   :  { %v106_v23 = vadd.f32 %v105_v21, %v103_v22 }
 0x180   :  { %108 = vst.msk [vmem:[%s210_s7] sm:$0xff] %vm107_vm3, %v106_v23 }

</bundles_post_ra>
